<compile_context>
chip_gen: v5e
topology: v5e:2x2
jax: 0.10.0
libtpu: 0.0.40
codegen_flags: <defaults>
</compile_context>

<pallas_src>
import functools
import math

import jax
import jax.numpy as jnp
from jax.experimental import pallas as pl
from jax.experimental.pallas import tpu as pltpu

HIDDEN = 32


# ------------------------------------------------------------------ kernel --
def mlp_forward_kernel(xp_ref, w1_ref, b1_ref, w2_ref, b2_ref, o_ref):
    """One batch tile, packed layout.

    xp_ref : (TP, obs_dim*PACK)      f32   -- PACK rows of x per packed row
    w1_ref : (obs_dim*PACK, 32*PACK) bf16  -- block-diagonal repeat of W1
    b1_ref : (1, 32*PACK)            f32   -- tiled b1
    w2_ref : (32*PACK, 32*PACK)      bf16  -- block-diagonal repeat of W2
    b2_ref : (1, 32*PACK)            f32   -- tiled b2
    o_ref  : (TP, 32*PACK)           f32   -- PACK output rows per packed row
    """
    # bf16 cast done in-kernel (VPU, hidden under the DMA) so HBM only ever
    # sees the original f32 x once.
    xp = xp_ref[...].astype(jnp.bfloat16)
    h1 = jnp.tanh(
        jnp.dot(xp, w1_ref[...], preferred_element_type=jnp.float32) + b1_ref[...]
    )
    h2 = jnp.tanh(
        jnp.dot(h1.astype(jnp.bfloat16), w2_ref[...],
                preferred_element_type=jnp.float32) + b2_ref[...]
    )
    o_ref[...] = h2.astype(o_ref.dtype)


# ----------------------------------------------------------- param packing --
def _choose_pack(obs_dim, hidden):
    """Smallest pack factor making both packed widths multiples of 128 lanes;
    otherwise settle for a lane-dense output only; otherwise no packing."""
    cands = (1, 2, 4, 8, 16)
    for p in cands:
        if (obs_dim * p) % 128 == 0 and (hidden * p) % 128 == 0:
            return p
    for p in cands:
        if (hidden * p) % 128 == 0:
            return p
    return 1


def _block_diag(w, reps):
    """(k, n) -> (reps*k, reps*n) block-diagonal repeat of w."""
    if reps == 1:
        return w
    k, n = w.shape
    eye = jnp.eye(reps, dtype=w.dtype)
    return jnp.einsum("pq,kn->pkqn", eye, w).reshape(reps * k, reps * n)


def pack_params(w1, b1, w2, b2):
    """Build the packed/replicated kernel parameters ONCE (hoisted out of the
    per-call forward graph, per perf review)."""
    obs_dim, hidden = w1.shape
    pack = _choose_pack(obs_dim, hidden)
    w1b = _block_diag(w1, pack).astype(jnp.bfloat16)       # (obs*P, 32*P)
    w2b = _block_diag(w2, pack).astype(jnp.bfloat16)       # (32*P, 32*P)
    b1p = jnp.tile(b1.reshape(1, hidden), (1, pack)).astype(jnp.float32)
    b2p = jnp.tile(b2.reshape(1, hidden), (1, pack)).astype(jnp.float32)
    return w1b, b1p, w2b, b2p


# ---------------------------------------------------------------- wrapper ---
def mlp_agent_forward(x, w1b, b1p, w2b, b2p, *, rows_per_tile=32768):
    """x: [B, obs_dim] f32 -> [B, 32] f32 (MLPAgent.forward, network trunk).

    w1b/b1p/w2b/b2p are the precomputed packed parameters from pack_params().
    """
    B, obs_dim = x.shape
    hidden = HIDDEN
    pack = b1p.shape[1] // hidden
    w_in, w_out = w1b.shape
    assert w_in == obs_dim * pack and w_out == hidden * pack

    # Pad batch to a multiple of the pack factor (zero rows, sliced off below).
    pad = (-B) % pack
    if pad:
        x = jnp.pad(x, ((0, pad), (0, 0)))
    bp = B + pad
    np_rows = bp // pack                       # number of packed rows

    # Lane-dense packed input: free contiguous reshape, stays f32.
    xp = x.reshape(np_rows, w_in)

    # Batch tile in packed rows (~rows_per_tile original rows, multiple of 8),
    # capped so the double-buffered f32-in + f32-out footprint stays well
    # inside the 32 MiB scoped-VMEM limit we request below.
    tp = max(8, (rows_per_tile // pack) // 8 * 8)
    bytes_per_packed_row = (w_in + w_out) * 4          # f32 in + f32 out
    vmem_budget = 24 * 1024 * 1024                     # headroom under 32 MiB
    max_tp = max(8, (vmem_budget // (2 * bytes_per_packed_row)) // 8 * 8)
    tp = min(tp, max_tp)
    if np_rows <= tp:
        tp = np_rows                           # single block == full extent
    grid = (pl.cdiv(np_rows, tp),)

    out = pl.pallas_call(
        mlp_forward_kernel,
        out_shape=jax.ShapeDtypeStruct((np_rows, w_out), jnp.float32),
        grid=grid,
        in_specs=[
            pl.BlockSpec((tp, w_in), lambda i: (i, 0)),     # x tile: pipelined
            pl.BlockSpec((w_in, w_out), lambda i: (0, 0)),  # weights: resident
            pl.BlockSpec((1, w_out), lambda i: (0, 0)),
            pl.BlockSpec((w_out, w_out), lambda i: (0, 0)),
            pl.BlockSpec((1, w_out), lambda i: (0, 0)),
        ],
        out_specs=pl.BlockSpec((tp, w_out), lambda i: (i, 0)),
        compiler_params=pltpu.CompilerParams(
            dimension_semantics=("parallel",),
            vmem_limit_bytes=32 * 1024 * 1024,
        ),
    )(xp, w1b, b1p, w2b, b2p)

    # Free row-major reshape back to (B, 32); drop the batch padding.
    return out.reshape(bp, hidden)[:B]


# ------------------------------------------------------------------ params --
def _orthogonal(key, shape, gain):
    """Orthogonal init following torch.nn.init.orthogonal_'s recipe.

    Same algorithm (tall QR + sign fix + transpose when rows < cols); RNG
    streams differ from PyTorch, so values are deterministic but not
    bit-identical to the torch module."""
    rows, cols = shape
    a = jax.random.normal(key, (max(rows, cols), min(rows, cols)), jnp.float32)
    q, r = jnp.linalg.qr(a)
    q = q * jnp.sign(jnp.diagonal(r))[None, :]
    if rows < cols:
        q = q.T
    return gain * q


def make_params(key, obs_dim):
    """Deterministic parameters mirroring MLPAgent.__init__ (network trunk).

    PyTorch Linear stores weight as [out, in]; we keep the transposed
    [in, out] layout so the kernel does plain x @ W."""
    k1, k2 = jax.random.split(key)
    gain = math.sqrt(2.0)
    w1 = _orthogonal(k1, (HIDDEN, obs_dim), gain).T      # [obs_dim, 32]
    b1 = jnp.zeros((1, HIDDEN), jnp.float32)
    w2 = _orthogonal(k2, (HIDDEN, HIDDEN), gain).T       # [32, 32]
    b2 = jnp.zeros((1, HIDDEN), jnp.float32)
    # TODO(synk): actor/critic heads (Linear(32, n_actions), Linear(32, 1)) and
    # the Categorical sampling in get_action/get_value are not part of
    # forward(); fusing them into the same pallas_call (so the 32-wide hidden
    # never hits HBM) is the next step for rollout latency.
    return w1, b1, w2, b2


def reference_forward(x, w1, b1, w2, b2):
    h1 = jnp.tanh(x @ w1 + b1)
    return jnp.tanh(h1 @ w2 + b2)


# -------------------------------------------------------------------- main --
if __name__ == "__main__":
    key = jax.random.PRNGKey(0)
    k_x, k_p, k_x2 = jax.random.split(key, 3)

    batch, obs_dim = 64, 16          # small flattened observation
    x = jax.random.normal(k_x, (batch, obs_dim), dtype=jnp.float32)
    w1, b1, w2, b2 = make_params(k_p, obs_dim)

    # Packed parameters built once, outside the per-call forward graph.
    packed = jax.tree.map(jax.block_until_ready, pack_params(w1, b1, w2, b2))

    fwd = jax.jit(mlp_agent_forward)
    out = jax.block_until_ready(fwd(x, *packed))

    ref = reference_forward(x, w1, b1, w2, b2)
    assert out.shape == (batch, HIDDEN)
    assert out.dtype == jnp.float32
    # bf16 matmul operands (f32 accumulation) on tanh-bounded outputs:
    # expected error ~1e-3; assert with a safe margin.
    err = float(jnp.max(jnp.abs(out - ref)))
    assert err < 5e-2, f"max abs error {err}"

    # Explicit non-multiple-batch / multi-block test: batch not a multiple of
    # the pack factor, tiny tile so the grid has a partial trailing block.
    batch2 = 77
    x2 = jax.random.normal(k_x2, (batch2, obs_dim), dtype=jnp.float32)
    fwd_small = jax.jit(functools.partial(mlp_agent_forward, rows_per_tile=16))
    out2 = jax.block_until_ready(fwd_small(x2, *packed))
    ref2 = reference_forward(x2, w1, b1, w2, b2)
    assert out2.shape == (batch2, HIDDEN)
    err2 = float(jnp.max(jnp.abs(out2 - ref2)))
    assert err2 < 5e-2, f"max abs error (ragged batch) {err2}"

    print("KERNEL_OK")
</pallas_src>

<mosaic_0001>
module attributes {stable_mosaic.version = 11 : i64} {
  func.func @mlp_forward_kernel(%arg0: i32, %arg1: memref<8x128xf32, #tpu.memory_space<vmem>>, %arg2: memref<128x256xbf16, #tpu.memory_space<vmem>>, %arg3: memref<1x256xf32, #tpu.memory_space<vmem>>, %arg4: memref<256x256xbf16, #tpu.memory_space<vmem>>, %arg5: memref<1x256xf32, #tpu.memory_space<vmem>>, %arg6: memref<8x256xf32, #tpu.memory_space<vmem>>) attributes {dimension_semantics = [#tpu.dimension_semantics<parallel>], iteration_bounds = array<i64: 1>, scalar_prefetch = 0 : i64, scratch_operands = 0 : i64, tpu.core_type = #tpu.core_type<tc>, window_params = [{transform_indices = @transform_0, window_bounds = array<i64: 8, 128>}, {pipeline_mode = #tpu.pipeline_mode<synchronous>, transform_indices = @transform_1, window_bounds = array<i64: 128, 256>}, {pipeline_mode = #tpu.pipeline_mode<synchronous>, transform_indices = @transform_2, window_bounds = array<i64: 1, 256>}, {pipeline_mode = #tpu.pipeline_mode<synchronous>, transform_indices = @transform_3, window_bounds = array<i64: 256, 256>}, {pipeline_mode = #tpu.pipeline_mode<synchronous>, transform_indices = @transform_4, window_bounds = array<i64: 1, 256>}, {transform_indices = @transform_5, window_bounds = array<i64: 8, 256>}]} {
    %c0 = arith.constant 0 : index
    %c0_0 = arith.constant 0 : index
    %0 = vector.load %arg1[%c0, %c0_0] : memref<8x128xf32, #tpu.memory_space<vmem>>, vector<8x128xf32>
    %1 = arith.truncf %0 : vector<8x128xf32> to vector<8x128xbf16>
    %c0_1 = arith.constant 0 : index
    %c0_2 = arith.constant 0 : index
    %2 = vector.load %arg2[%c0_1, %c0_2] : memref<128x256xbf16, #tpu.memory_space<vmem>>, vector<128x256xbf16>
    %cst = arith.constant dense<0.000000e+00> : vector<8x256xf32>
    %3 = tpu.matmul %1, %2, %cst {dimension_numbers = #tpu.dot_dimension_numbers<[1], [0], [0], [1], [0, 0, 1, 1], [], []>} : vector<8x128xbf16>, vector<128x256xbf16>, vector<8x256xf32> -> vector<8x256xf32>
    %c0_3 = arith.constant 0 : index
    %c0_4 = arith.constant 0 : index
    %4 = vector.load %arg3[%c0_3, %c0_4] : memref<1x256xf32, #tpu.memory_space<vmem>>, vector<1x256xf32>
    %5 = vector.broadcast %4 : vector<1x256xf32> to vector<8x256xf32>
    %6 = arith.addf %3, %5 : vector<8x256xf32>
    %7 = math.tanh %6 : vector<8x256xf32>
    %8 = arith.truncf %7 : vector<8x256xf32> to vector<8x256xbf16>
    %c0_5 = arith.constant 0 : index
    %c0_6 = arith.constant 0 : index
    %9 = vector.load %arg4[%c0_5, %c0_6] : memref<256x256xbf16, #tpu.memory_space<vmem>>, vector<256x256xbf16>
    %cst_7 = arith.constant dense<0.000000e+00> : vector<8x256xf32>
    %10 = tpu.matmul %8, %9, %cst_7 {dimension_numbers = #tpu.dot_dimension_numbers<[1], [0], [0], [1], [0, 0, 1, 1], [], []>} : vector<8x256xbf16>, vector<256x256xbf16>, vector<8x256xf32> -> vector<8x256xf32>
    %c0_8 = arith.constant 0 : index
    %c0_9 = arith.constant 0 : index
    %11 = vector.load %arg5[%c0_8, %c0_9] : memref<1x256xf32, #tpu.memory_space<vmem>>, vector<1x256xf32>
    %12 = vector.broadcast %11 : vector<1x256xf32> to vector<8x256xf32>
    %13 = arith.addf %10, %12 : vector<8x256xf32>
    %14 = math.tanh %13 : vector<8x256xf32>
    %c0_10 = arith.constant 0 : index
    %c0_11 = arith.constant 0 : index
    %15 = vector.load %arg6[%c0_10, %c0_11] : memref<8x256xf32, #tpu.memory_space<vmem>>, vector<8x256xf32>
    tpu.vector_store %arg6[%c0_10, %c0_11], %14 {strides = array<i32>} : memref<8x256xf32, #tpu.memory_space<vmem>>, vector<8x256xf32>,
    return
  }
  func.func @transform_0(%arg0: i32) -> (i32, i32) {
    %c0_i32 = arith.constant 0 : i32
    %c0_i32_0 = arith.constant 0 : i32
    return %arg0, %c0_i32 : i32, i32
  }
  func.func @transform_1(%arg0: i32) -> (i32, i32) {
    %c0_i32 = arith.constant 0 : i32
    %c0_i32_0 = arith.constant 0 : i32
    %c0_i32_1 = arith.constant 0 : i32
    return %c0_i32, %c0_i32_0 : i32, i32
  }
  func.func @transform_2(%arg0: i32) -> (i32, i32) {
    %c0_i32 = arith.constant 0 : i32
    %c0_i32_0 = arith.constant 0 : i32
    %c0_i32_1 = arith.constant 0 : i32
    return %c0_i32, %c0_i32_0 : i32, i32
  }
  func.func @transform_3(%arg0: i32) -> (i32, i32) {
    %c0_i32 = arith.constant 0 : i32
    %c0_i32_0 = arith.constant 0 : i32
    %c0_i32_1 = arith.constant 0 : i32
    return %c0_i32, %c0_i32_0 : i32, i32
  }
  func.func @transform_4(%arg0: i32) -> (i32, i32) {
    %c0_i32 = arith.constant 0 : i32
    %c0_i32_0 = arith.constant 0 : i32
    %c0_i32_1 = arith.constant 0 : i32
    return %c0_i32, %c0_i32_0 : i32, i32
  }
  func.func @transform_5(%arg0: i32) -> (i32, i32) {
    %c0_i32 = arith.constant 0 : i32
    %c0_i32_0 = arith.constant 0 : i32
    return %arg0, %c0_i32 : i32, i32
  }
}

</mosaic_0001>

<bundles_post_ra>
// kernel: mlp_agent_forward.1
= control target key start
LH: loop header
LB: loop body
LE: loop exit
PB: predicated region body
PF: predicated region fallthrough
CT: control target
= control target key end

     0   :  { %10 = vsyncpa [#allocation3], 0  ;;  %s706_s21 = smov [#allocation2]   ;;  %s707_s23 = smov 128   ;;  %s853_s0 = inlined_call_operand.vmem [shape: f32[8,128], index: 0, kind: input, shape index: {}]   ;;  %s854_s1 = inlined_call_operand.vmem [shape: bf16[128,256], index: 1, kind: input, shape index: {}]   ;;  %s855_s2 = inlined_call_operand.vmem [shape: f32[1,256], index: 2, kind: input, shape index: {}]   ;;  %s856_s3 = inlined_call_operand.hbm [shape: bf16[256,256], index: 3, kind: input, shape index: {}]   ;;  %s857_s4 = inlined_call_operand.vmem [shape: f32[1,256], index: 4, kind: input, shape index: {}]   ;;  %s858_s5 = inlined_call_operand.vmem [shape: f32[8,256], index: 5, kind: output, shape index: {}]  }
   0x1   :  { %s21_s20 = sshll.u32 %s856_s3, 4  ;;  %s23_s22 = sshll.u32 %s706_s21, 4  ;;  %s22_s20 = int_to_ptr.hbm [resolvable:$true] %s21_s20  ;;  %s24_s22 = int_to_ptr.vmem [resolvable:$true] %s23_s22 }
   0x2   :  { %s708_s24 = smov 8  }
   0x3   :  { %29 = dma.hbm_to_vmem [thread:$0]  %s22_s20, 4096, %s24_s22, [#allocation3], %s707_s23, %s707_s23, %s708_s24  }
   0x4   :  { %704 = dma.done.wait [#allocation3], 4096  }
   0x5   :  { %705 = vsyncadd [#allocation3], 4294963200  ;;  %v487_v0 = vld [vmem:[%s854_s1 + $0x70] sm:$0xf]  ;;  %v636_v1 = vld [vmem:[%s854_s1 + $0x74] sm:$0xf0] }
   0x6   :  { %v635_v2 = vld [vmem:[%s854_s1 + $0x74] sm:$0xf]  ;;  %v488_v3 = vor.u32 %v636_v1, %v487_v0  ;;  %v489_v4 = vld [vmem:[%s854_s1 + $0x78] sm:$0xf0]  ;;  %v479_v5 = vld [vmem:[%s854_s1 + $0x60] sm:$0xf] }
   0x7   :  { %v634_v6 = vld [vmem:[%s854_s1 + $0x64] sm:$0xf0]  ;;  %v492_v7 = vor.u32 %v635_v2, %v489_v4  ;;  %v633_v8 = vld [vmem:[%s854_s1 + $0x64] sm:$0xf]  ;;  %v481_v9 = vld [vmem:[%s854_s1 + $0x68] sm:$0xf0] }
   0x8   :  { %140 = vmatpush.bf16.msra.mxu0 %v488_v3  ;;  %v480_v10 = vor.u32 %v634_v6, %v479_v5  ;;  %v484_v11 = vor.u32 %v633_v8, %v481_v9  ;;  %v471_v12 = vld [vmem:[%s854_s1 + $0x50] sm:$0xf]  ;;  %v632_v13 = vld [vmem:[%s854_s1 + $0x54] sm:$0xf0]  ;;  %v631_v14 = vld [vmem:[%s854_s1 + $0x54] sm:$0xf] }
   0x9   :  { %153 = vmatpush.bf16.msra.mxu1 %v492_v7  ;;  %v473_v15 = vld [vmem:[%s854_s1 + $0x58] sm:$0xf0]  ;;  %v472_v16 = vor.u32 %v632_v13, %v471_v12  ;;  %v463_v18 = vld [vmem:[%s854_s1 + $0x40] sm:$0xf]  ;;  %v630_v19 = vld [vmem:[%s854_s1 + $0x44] sm:$0xf0] }
   0xa   :  { %v476_v17 = vor.u32 %v631_v14, %v473_v15  ;;  %v629_v20 = vld [vmem:[%s854_s1 + $0x44] sm:$0xf]  ;;  %v465_v21 = vld [vmem:[%s854_s1 + $0x48] sm:$0xf0]  ;;  %v464_v22 = vor.u32 %v630_v19, %v463_v18  ;;  %v551_v23 = vld [vmem:[#allocation2 + $0x70] sm:$0xf] }
   0xb   :  { %v652_v24 = vld [vmem:[#allocation2 + $0x74] sm:$0xf0]  ;;  %v615_v25 = vld [vmem:[#allocation2 + $0xf0] sm:$0xf]  ;;  %v468_v26 = vor.u32 %v629_v20, %v465_v21  ;;  %v627_v31 = vld [vmem:[%s854_s1 + $0x34] sm:$0xf] }
   0xc   :  { %141 = vmatpush.bf16.msra.mxu0 %v480_v10  ;;  %v455_v27 = vld [vmem:[%s854_s1 + $0x30] sm:$0xf]  ;;  %v628_v28 = vld [vmem:[%s854_s1 + $0x34] sm:$0xf0]  ;;  %v552_v29 = vor.u32 %v652_v24, %v551_v23  ;;  %v457_v32 = vld [vmem:[%s854_s1 + $0x38] sm:$0xf0] }
   0xd   :  { %154 = vmatpush.bf16.msra.mxu1 %v484_v11  ;;  %v668_v30 = vld [vmem:[#allocation2 + $0xf4] sm:$0xf0]  ;;  %v543_v34 = vld [vmem:[#allocation2 + $0x60] sm:$0xf]  ;;  %v650_v35 = vld [vmem:[#allocation2 + $0x64] sm:$0xf0]  ;;  %v456_v38 = vor.u32 %v628_v28, %v455_v27  ;;  %v460_v43 = vor.u32 %v627_v31, %v457_v32 }
   0xe   :  { %v616_v33 = vor.u32 %v668_v30, %v615_v25  ;;  %368 = vmatpush.bf16.msra.mxu2 %v552_v29  ;;  %v607_v36 = vld [vmem:[#allocation2 + $0xe0] sm:$0xf]  ;;  %v666_v37 = vld [vmem:[#allocation2 + $0xe4] sm:$0xf0]  ;;  %v544_v41 = vor.u32 %v650_v35, %v543_v34  ;;  %v625_v44 = vld [vmem:[%s854_s1 + $0x24] sm:$0xf] }
   0xf   :  { %v447_v39 = vld [vmem:[%s854_s1 + $0x20] sm:$0xf]  ;;  %v626_v40 = vld [vmem:[%s854_s1 + $0x24] sm:$0xf0]  ;;  %v608_v42 = vor.u32 %v666_v37, %v607_v36  ;;  %v535_v45 = vld [vmem:[#allocation2 + $0x50] sm:$0xf] }
  0x10   :  { %142 = vmatpush.bf16.msra.mxu0 %v472_v16  ;;  %381 = vmatpush.bf16.msra.mxu3 %v616_v33  ;;  %v648_v46 = vld [vmem:[#allocation2 + $0x54] sm:$0xf0]  ;;  %v449_v47 = vld [vmem:[%s854_s1 + $0x28] sm:$0xf0]  ;;  %v599_v48 = vld [vmem:[#allocation2 + $0xd0] sm:$0xf]  ;;  %v448_v51 = vor.u32 %v626_v40, %v447_v39 }
  0x11   :  { %155 = vmatpush.bf16.msra.mxu1 %v476_v17  ;;  %v664_v49 = vld [vmem:[#allocation2 + $0xd4] sm:$0xf0]  ;;  %v536_v50 = vor.u32 %v648_v46, %v535_v45  ;;  %v439_v52 = vld [vmem:[%s854_s1 + $0x10] sm:$0xf]  ;;  %v527_v54 = vld [vmem:[#allocation2 + $0x40] sm:$0xf]  ;;  %v452_v56 = vor.u32 %v625_v44, %v449_v47 }
  0x12   :  { %369 = vmatpush.bf16.msra.mxu2 %v544_v41  ;;  %v600_v53 = vor.u32 %v664_v49, %v599_v48  ;;  %v646_v55 = vld [vmem:[#allocation2 + $0x44] sm:$0xf0]  ;;  %v624_v57 = vld [vmem:[%s854_s1 + $0x14] sm:$0xf0]  ;;  %v591_v58 = vld [vmem:[#allocation2 + $0xc0] sm:$0xf] }
  0x13   :  { %v662_v59 = vld [vmem:[#allocation2 + $0xc4] sm:$0xf0]  ;;  %v623_v60 = vld [vmem:[%s854_s1 + $0x14] sm:$0xf]  ;;  %v441_v61 = vld [vmem:[%s854_s1 + $0x18] sm:$0xf0]  ;;  %v528_v63 = vor.u32 %v646_v55, %v527_v54  ;;  %v440_v0 = vor.u32 %v624_v57, %v439_v52 }
  0x14   :  { %143 = vmatpush.bf16.msra.mxu0 %v464_v22  ;;  %382 = vmatpush.bf16.msra.mxu3 %v608_v42  ;;  %v431_v62 = vld [vmem:[%s854_s1] sm:$0xf]  ;;  %v622_v1 = vld [vmem:[%s854_s1 + $0x4] sm:$0xf0]  ;;  %v592_v2 = vor.u32 %v662_v59, %v591_v58  ;;  %v519_v3 = vld [vmem:[#allocation2 + $0x30] sm:$0xf]  ;;  %v444_v5 = vor.u32 %v623_v60, %v441_v61 }
  0x15   :  { %156 = vmatpush.bf16.msra.mxu1 %v468_v26  ;;  %v644_v4 = vld [vmem:[#allocation2 + $0x34] sm:$0xf0]  ;;  %v621_v6 = vld [vmem:[%s854_s1 + $0x4] sm:$0xf]  ;;  %v583_v7 = vld [vmem:[#allocation2 + $0xb0] sm:$0xf]  ;;  %v432_v15 = vor.u32 %v622_v1, %v431_v62 }
  0x16   :  { %370 = vmatpush.bf16.msra.mxu2 %v536_v50  ;;  %v660_v8 = vld [vmem:[#allocation2 + $0xb4] sm:$0xf0]  ;;  %v433_v9 = vld [vmem:[%s854_s1 + $0x8] sm:$0xf0]  ;;  %v651_v10 = vld [vmem:[#allocation2 + $0x74] sm:$0xf]  ;;  %v520_v14 = vor.u32 %v644_v4, %v519_v3 }
  0x17   :  { %v553_v11 = vld [vmem:[#allocation2 + $0x78] sm:$0xf0]  ;;  %v667_v12 = vld [vmem:[#allocation2 + $0xf4] sm:$0xf]  ;;  %v36_v16 = vld [vmem:[%s853_s0] sm:$0xff]  ;;  %v584_v17 = vor.u32 %v660_v8, %v583_v7  ;;  %v436_v18 = vor.u32 %v621_v6, %v433_v9 }
  0x18   :  { %144 = vmatpush.bf16.msra.mxu0 %v456_v38  ;;  %383 = vmatpush.bf16.msra.mxu3 %v600_v53  ;;  %v617_v13 = vld [vmem:[#allocation2 + $0xf8] sm:$0xf0]  ;;  %v556_v19 = vor.u32 %v651_v10, %v553_v11  ;;  %v649_v21 = vld [vmem:[#allocation2 + $0x64] sm:$0xf]  ;;  %v545_v22 = vld [vmem:[#allocation2 + $0x68] sm:$0xf0]  ;;  %v37_v23 = vpack.c.bf16 %v36_v16, %v36_v16 }
  0x19   :  { %157 = vmatpush.bf16.msra.mxu1 %v460_v43  ;;  %v620_v20 = vor.u32 %v667_v12, %v617_v13  ;;  %v665_v24 = vld [vmem:[#allocation2 + $0xe4] sm:$0xf]  ;;  %v609_v25 = vld [vmem:[#allocation2 + $0xe8] sm:$0xf0]  ;;  %v548_v26 = vor.u32 %v649_v21, %v545_v22  ;;  %v647_v28 = vld [vmem:[#allocation2 + $0x54] sm:$0xf] }
  0x1a   :  { %371 = vmatpush.bf16.msra.mxu2 %v528_v63  ;;  %v612_v27 = vor.u32 %v665_v24, %v609_v25  ;;  %v537_v29 = vld [vmem:[#allocation2 + $0x58] sm:$0xf0]  ;;  %v663_v30 = vld [vmem:[#allocation2 + $0xd4] sm:$0xf]  ;;  %v645_v34 = vld [vmem:[#allocation2 + $0x44] sm:$0xf] }
  0x1b   :  { %v601_v31 = vld [vmem:[#allocation2 + $0xd8] sm:$0xf0]  ;;  %v540_v32 = vor.u32 %v647_v28, %v537_v29  ;;  %v529_v35 = vld [vmem:[#allocation2 + $0x48] sm:$0xf0]  ;;  %v661_v36 = vld [vmem:[#allocation2 + $0xc4] sm:$0xf] }
  0x1c   :  { %145 = vmatpush.bf16.msra.mxu0 %v448_v51  ;;  %384 = vmatpush.bf16.msra.mxu3 %v592_v2  ;;  %v604_v33 = vor.u32 %v663_v30, %v601_v31  ;;  %v593_v37 = vld [vmem:[#allocation2 + $0xc8] sm:$0xf0]  ;;  %v532_v38 = vor.u32 %v645_v34, %v529_v35  ;;  %v643_v40 = vld [vmem:[#allocation2 + $0x34] sm:$0xf]  ;;  %v521_v41 = vld [vmem:[#allocation2 + $0x38] sm:$0xf0] }
  0x1d   :  { %158 = vmatpush.bf16.msra.mxu1 %v452_v56  ;;  %v596_v39 = vor.u32 %v661_v36, %v593_v37  ;;  %v659_v42 = vld [vmem:[#allocation2 + $0xb4] sm:$0xf]  ;;  %v585_v43 = vld [vmem:[#allocation2 + $0xb8] sm:$0xf0]  ;;  %v524_v44 = vor.u32 %v643_v40, %v521_v41  ;;  %v511_v46 = vld [vmem:[#allocation2 + $0x20] sm:$0xf] }
  0x1e   :  { %372 = vmatpush.bf16.msra.mxu2 %v520_v14  ;;  %v588_v45 = vor.u32 %v659_v42, %v585_v43  ;;  %v642_v47 = vld [vmem:[#allocation2 + $0x24] sm:$0xf0]  ;;  %v575_v48 = vld [vmem:[#allocation2 + $0xa0] sm:$0xf]  ;;  %v641_v51 = vld [vmem:[#allocation2 + $0x24] sm:$0xf] }
  0x1f   :  { %v512_v49 = vor.u32 %v642_v47, %v511_v46  ;;  %v658_v50 = vld [vmem:[#allocation2 + $0xa4] sm:$0xf0]  ;;  %v513_v53 = vld [vmem:[#allocation2 + $0x28] sm:$0xf0]  ;;  %v657_v54 = vld [vmem:[#allocation2 + $0xa4] sm:$0xf] }
  0x20   :  { %146 = vmatpush.bf16.msra.mxu0 %v440_v0  ;;  %385 = vmatpush.bf16.msra.mxu3 %v584_v17  ;;  %v576_v52 = vor.u32 %v658_v50, %v575_v48  ;;  %v577_v55 = vld [vmem:[#allocation2 + $0xa8] sm:$0xf0]  ;;  %v516_v56 = vor.u32 %v641_v51, %v513_v53  ;;  %v503_v58 = vld [vmem:[#allocation2 + $0x10] sm:$0xf]  ;;  %v640_v59 = vld [vmem:[#allocation2 + $0x14] sm:$0xf0] }
  0x21   :  { %159 = vmatpush.bf16.msra.mxu1 %v444_v5  ;;  %v580_v57 = vor.u32 %v657_v54, %v577_v55  ;;  %v567_v60 = vld [vmem:[#allocation2 + $0x90] sm:$0xf]  ;;  %v504_v61 = vor.u32 %v640_v59, %v503_v58  ;;  %v656_v62 = vld [vmem:[#allocation2 + $0x94] sm:$0xf0]  ;;  %v639_v63 = vld [vmem:[#allocation2 + $0x14] sm:$0xf] }
  0x22   :  { %373 = vmatpush.bf16.msra.mxu2 %v512_v49  ;;  %v505_v0 = vld [vmem:[#allocation2 + $0x18] sm:$0xf0]  ;;  %v568_v1 = vor.u32 %v656_v62, %v567_v60  ;;  %v655_v3 = vld [vmem:[#allocation2 + $0x94] sm:$0xf]  ;;  %v495_v6 = vld [vmem:[#allocation2] sm:$0xf] }
  0x23   :  { %v508_v2 = vor.u32 %v639_v63, %v505_v0  ;;  %v569_v4 = vld [vmem:[#allocation2 + $0x98] sm:$0xf0]  ;;  %v638_v7 = vld [vmem:[#allocation2 + $0x4] sm:$0xf0]  ;;  %v559_v8 = vld [vmem:[#allocation2 + $0x80] sm:$0xf] }
  0x24   :  { %147 = vmatpush.bf16.msra.mxu0 %v432_v15  ;;  %386 = vmatpush.bf16.msra.mxu3 %v576_v52  ;;  %v572_v5 = vor.u32 %v655_v3, %v569_v4  ;;  %v496_v9 = vor.u32 %v638_v7, %v495_v6  ;;  %v654_v10 = vld [vmem:[#allocation2 + $0x84] sm:$0xf0]  ;;  %v637_v11 = vld [vmem:[#allocation2 + $0x4] sm:$0xf]  ;;  %v497_v12 = vld [vmem:[#allocation2 + $0x8] sm:$0xf0] }
  0x25   :  { %160 = vmatpush.bf16.msra.mxu1 %v436_v18  ;;  %v560_v13 = vor.u32 %v654_v10, %v559_v8  ;;  %v500_v14 = vor.u32 %v637_v11, %v497_v12  ;;  %v653_v15 = vld [vmem:[#allocation2 + $0x84] sm:$0xf]  ;;  %v561_v16 = vld [vmem:[#allocation2 + $0x88] sm:$0xf0]  ;;  %v54_v18 = vld [vmem:[%s855_s2] sm:$0x3] }
  0x26   :  { %374 = vmatpush.bf16.msra.mxu2 %v504_v61  ;;  %v564_v17 = vor.u32 %v653_v15, %v561_v16  ;;  %v202_v31 = vld [vmem:[%s857_s4] sm:$0x3] }
  0x27   :  { %148 = vmatmul.bf16.vlgmr.msra.gmra.mxu0 %v37_v23  ;;  %v204_v37 = vperm.slane %v202_v31, 0 }
  0x28   :  { %394 = vmatpush.bf16.msrb.mxu0 %v556_v19  ;;  %161 = vmatmul.bf16.vlgmr.msra.gmra.mxu1 %v37_v23  ;;  %v56_v19 = vperm.slane %v54_v18, 0 }
  0x29   :  { %407 = vmatpush.bf16.msrb.mxu1 %v620_v20  ;;  %387 = vmatpush.bf16.msra.mxu3 %v568_v1  ;;  %v57_v20 = vperm.slane %v54_v18, 1 }
  0x2a   :  { %375 = vmatpush.bf16.msra.mxu2 %v496_v9 }
  0x2c   :  { %395 = vmatpush.bf16.msrb.mxu0 %v548_v26 }
  0x2d   :  { %408 = vmatpush.bf16.msrb.mxu1 %v612_v27  ;;  %388 = vmatpush.bf16.msra.mxu3 %v560_v13 }
  0x30   :  { %396 = vmatpush.bf16.msrb.mxu0 %v540_v32  ;;  %v205_v32 = vperm.slane %v202_v31, 1 }
  0x31   :  { %409 = vmatpush.bf16.msrb.mxu1 %v604_v33 }
  0x34   :  { %397 = vmatpush.bf16.msrb.mxu0 %v532_v38 }
  0x35   :  { %410 = vmatpush.bf16.msrb.mxu1 %v596_v39 }
  0x38   :  { %398 = vmatpush.bf16.msrb.mxu0 %v524_v44 }
  0x39   :  { %411 = vmatpush.bf16.msrb.mxu1 %v588_v45 }
  0x3c   :  { %399 = vmatpush.bf16.msrb.mxu0 %v516_v56 }
  0x3d   :  { %412 = vmatpush.bf16.msrb.mxu1 %v580_v57 }
  0x40   :  { %400 = vmatpush.bf16.msrb.mxu0 %v508_v2 }
  0x41   :  { %413 = vmatpush.bf16.msrb.mxu1 %v572_v5 }
  0x44   :  { %401 = vmatpush.bf16.msrb.mxu0 %v500_v14 }
  0x45   :  { %414 = vmatpush.bf16.msrb.mxu1 %v564_v17 }
  0xa4   :  { %v149_v21 = vpop.f32.mrf.mxu0 }
  0xa5   :  { %v150_v22 = vadd.f32 %v149_v21, %v56_v19  ;;  %v162_v23 = vpop.f32.mrf.mxu1 }
  0xa6   :  { %v163_v24 = vadd.f32 %v162_v23, %v57_v20 }
  0xa7   :  { %672 = vtanh.f32 %v150_v22 }
  0xa8   :  { %674 = vtanh.f32 %v163_v24 }
  0xac   :  { %v151_v25 = vpop.f32.mrf.mxu0 }
  0xad   :  { %v673_v26 = vpop.eup %672  ;;  %v164_v27 = vpop.f32.mrf.mxu1 }
  0xae   :  { %v675_v28 = vpop.eup %674  ;;  %v168_v29 = vpack.c.bf16 %v673_v26, %v673_v26 }
  0xaf   :  { %v169_v30 = vpack.c.bf16 %v675_v28, %v675_v28 }
  0xb0   :  { %376 = vmatmul.bf16.vlgmr.msra.gmra.mxu2 %v168_v29  ;;  %402 = vmatmul.bf16.vlgmr.msrb.gmra.mxu0 %v168_v29 }
  0xb1   :  { %389 = vmatmul.bf16.vlgmr.msra.gmra.mxu3 %v169_v30  ;;  %415 = vmatmul.bf16.vlgmr.msrb.gmra.mxu1 %v169_v30 }
 0x12d   :  { %v403_v33 = vpop.f32.mrf.mxu0 }
 0x12e   :  { %v404_v34 = vadd.f32 %v403_v33, %v205_v32  ;;  %v416_v35 = vpop.f32.mrf.mxu1 }
 0x130   :  { %v417_v36 = vadd.f32 %v416_v35, %v404_v34 }
 0x132   :  { %676 = vtanh.f32 %v417_v36 }
 0x133   :  { %v377_v38 = vpop.f32.mrf.mxu2 }
 0x134   :  { %v378_v39 = vadd.f32 %v377_v38, %v204_v37  ;;  %v390_v40 = vpop.f32.mrf.mxu3 }
 0x135   :  { %v405_v41 = vpop.f32.mrf.mxu0 }
 0x136   :  { %v391_v42 = vadd.f32 %v390_v40, %v378_v39  ;;  %v418_v43 = vpop.f32.mrf.mxu1 }
 0x138   :  { %v677_v44 = vpop.eup %676  ;;  %678 = vtanh.f32 %v391_v42 }
 0x139   :  { %423 = vst [vmem:[%s858_s5 + $0x8] sm:$0xff] %v677_v44 }
 0x13b   :  { %v379_v45 = vpop.f32.mrf.mxu2 }
 0x13c   :  { %v392_v46 = vpop.f32.mrf.mxu3 }
 0x13e   :  { %v679_v47 = vpop.eup %678 }
 0x13f   :  { %422 = vst [vmem:[%s858_s5] sm:$0xff] %v679_v47 }
 0x140   :  { %428 = vsyncpa [#allocation3], 1 }

</bundles_post_ra>
